<compile_context>
chip_gen: v7x
topology: tpu7x:2x2x1
jax: 0.10.0
libtpu: 0.0.40
codegen_flags: <defaults>
</compile_context>

<pallas_src>
import functools

import jax
import jax.numpy as jnp
from jax import lax
from jax.experimental import pallas as pl
from jax.experimental.pallas import tpu as pltpu


def _round_up(x, m):
    return ((x + m - 1) // m) * m


def _pick_time_chunk(seq_len, requested):
    """Pick a chunk length near `requested` that divides seq_len if possible."""
    requested = max(1, min(requested, seq_len))
    lo = max(1, requested // 2)
    for c in range(requested, lo - 1, -1):
        if seq_len % c == 0:
            return c
    return requested  # no nice divisor; caller pads + masks the tail.


def _rnn_fc_kernel(xw_ref, whh_ref, wfc_ref, bfc_ref, out_ref, h_scratch,
                   *, seq_len, time_chunk, needs_mask):
    """One grid step = one (batch_tile, time_chunk) block of the recurrence.

    xw_ref : (time_chunk, batch_tile, hidden_pad)  precomputed x@W_ih^T + bias
    whh_ref: (hidden_pad, hidden_pad)              W_hh^T (possibly bf16)
    wfc_ref: (hidden_pad, out_pad)                 W_fc^T (possibly bf16)
    bfc_ref: (1, out_pad)                          fc bias (f32)
    out_ref: (batch_tile, out_pad)                 final fc output (f32)
    h_scratch: (batch_tile, hidden_pad) f32        hidden state carried across chunks
    """
    t_chunk = pl.program_id(1)          # time-chunk index (sequential axis)

    @pl.when(t_chunk == 0)
    def _init():
        h_scratch[...] = jnp.zeros_like(h_scratch)

    base_t = t_chunk * time_chunk
    whh = whh_ref[...]                  # load once per grid step; reused by unroll

    def step(i, h):
        # MXU: bf16/f32 inputs, f32 accumulation.  VPU/EUP work stays f32.
        pre = xw_ref[i].astype(jnp.float32) + jnp.dot(
            h.astype(whh.dtype), whh, preferred_element_type=jnp.float32)
        h_new = jnp.tanh(pre)
        if needs_mask:
            # Only the tail of the last chunk can be past seq_len; a scalar-broadcast
            # select keeps h unchanged for padded time steps.
            h_new = jnp.where(base_t + i < seq_len, h_new, h)
        return h_new

    h = lax.fori_loop(0, time_chunk, step, h_scratch[...], unroll=True)
    h_scratch[...] = h

    @pl.when(t_chunk == pl.num_programs(1) - 1)
    def _finish():
        out = jnp.dot(h.astype(wfc_ref.dtype), wfc_ref[...],
                      preferred_element_type=jnp.float32) + bfc_ref[...]
        out_ref[...] = out.astype(out_ref.dtype)


@functools.partial(jax.jit, static_argnames=("time_chunk", "param_dtype"))
def rnn_model_forward(x, w_ih, w_hh, b_ih, b_hh, w_fc, b_fc,
                      *, time_chunk=16, param_dtype=jnp.float32):
    """x: (batch, seq, input_size) — PyTorch batch_first convention. Returns (batch, output_size) f32."""
    batch, seq, input_size = x.shape
    hidden_size = w_ih.shape[0]
    output_size = w_fc.shape[0]

    # ---- MXU / vreg aligned sizes -------------------------------------------
    hidden_pad = _round_up(hidden_size, 128)
    out_pad = _round_up(output_size, 128)           # lane-dense output stores
    batch_tile = 128 if batch > 128 else _round_up(batch, 8)
    batch_pad = _round_up(batch, batch_tile)

    chunk = _pick_time_chunk(seq, time_chunk)
    seq_pad = _round_up(seq, chunk)
    num_chunks = seq_pad // chunk
    num_batch_tiles = batch_pad // batch_tile
    needs_mask = seq_pad != seq

    f32 = jnp.float32
    x_f = x.astype(f32)

    # ---- Hoisted, time-parallel input projection (one big XLA matmul) -------
    # Also folds batch_first -> time-major: no separate transpose pass over HBM.
    wih_t = jnp.transpose(w_ih).astype(f32)                      # (input, hidden)
    b_rnn = (b_ih + b_hh).astype(f32)                            # (hidden,)
    xw = jnp.einsum("bti,ih->tbh", x_f, wih_t,
                    preferred_element_type=f32) + b_rnn          # (seq, batch, hidden)

    # Zero-pad to aligned shapes.  Zeros are preserved through tanh/matmul in the
    # padded hidden lanes; padded batch rows / output lanes are sliced off below;
    # padded time steps are masked inside the kernel.
    xw = jnp.pad(xw, ((0, seq_pad - seq),
                      (0, batch_pad - batch),
                      (0, hidden_pad - hidden_size))).astype(param_dtype)

    whh_t = jnp.pad(jnp.transpose(w_hh).astype(f32),
                    ((0, hidden_pad - hidden_size),
                     (0, hidden_pad - hidden_size))).astype(param_dtype)
    wfc_t = jnp.pad(jnp.transpose(w_fc).astype(f32),
                    ((0, hidden_pad - hidden_size),
                     (0, out_pad - output_size))).astype(param_dtype)
    bfc = jnp.pad(b_fc.astype(f32), (0, out_pad - output_size)).reshape(1, out_pad)

    kernel = functools.partial(_rnn_fc_kernel, seq_len=seq, time_chunk=chunk,
                               needs_mask=needs_mask)

    grid_spec = pltpu.PrefetchScalarGridSpec(
        num_scalar_prefetch=0,
        grid=(num_batch_tiles, num_chunks),        # time (serial) axis last
        in_specs=[
            pl.BlockSpec((chunk, batch_tile, hidden_pad), lambda b, t: (t, b, 0)),
            pl.BlockSpec((hidden_pad, hidden_pad), lambda b, t: (0, 0)),
            pl.BlockSpec((hidden_pad, out_pad), lambda b, t: (0, 0)),
            pl.BlockSpec((1, out_pad), lambda b, t: (0, 0)),
        ],
        out_specs=pl.BlockSpec((batch_tile, out_pad), lambda b, t: (b, 0)),
        scratch_shapes=[pltpu.VMEM((batch_tile, hidden_pad), jnp.float32)],
    )

    out_padded = pl.pallas_call(
        kernel,
        out_shape=jax.ShapeDtypeStruct((batch_pad, out_pad), jnp.float32),
        grid_spec=grid_spec,
        compiler_params=pltpu.CompilerParams(
            # batch tiles parallel across TensorCores (v7x megacore), time serial.
            dimension_semantics=("parallel", "arbitrary"),
            # Explicit, conservative scoped-VMEM budget: safe on v5e/v6e (128 MiB
            # physical) and within v7x's 64 MiB; far above what these tiles need.
            vmem_limit_bytes=32 * 1024 * 1024,
        ),
    )(xw, whh_t, wfc_t, bfc)

    return out_padded[:batch, :output_size]


def _reference_forward(x, w_ih, w_hh, b_ih, b_hh, w_fc, b_fc):
    """Pure-JAX reference matching torch.nn.RNN(batch_first=True) + Linear."""
    batch, seq, _ = x.shape
    hidden_size = w_ih.shape[0]
    h = jnp.zeros((batch, hidden_size), jnp.float32)
    for t in range(seq):
        h = jnp.tanh(x[:, t, :] @ w_ih.T + b_ih + h @ w_hh.T + b_hh)
    return h @ w_fc.T + b_fc


if __name__ == "__main__":
    # Small shapes consistent with the module's forward.
    batch, seq = 4, 8
    input_size, hidden_size, output_size = 16, 32, 8

    key = jax.random.PRNGKey(0)
    ks = jax.random.split(key, 9)
    bound = 1.0 / (hidden_size ** 0.5)

    x = jax.random.normal(ks[0], (batch, seq, input_size), jnp.float32)
    w_ih = jax.random.uniform(ks[1], (hidden_size, input_size), jnp.float32,
                              -bound, bound)
    w_hh = jax.random.uniform(ks[2], (hidden_size, hidden_size), jnp.float32,
                              -bound, bound)
    b_ih = jax.random.uniform(ks[3], (hidden_size,), jnp.float32, -bound, bound)
    b_hh = jax.random.uniform(ks[4], (hidden_size,), jnp.float32, -bound, bound)
    w_fc = jax.random.uniform(ks[5], (output_size, hidden_size), jnp.float32,
                              -bound, bound)
    b_fc = jax.random.uniform(ks[6], (output_size,), jnp.float32, -bound, bound)

    # --- f32 path (exact PyTorch semantics, single time chunk) ---------------
    out = rnn_model_forward(x, w_ih, w_hh, b_ih, b_hh, w_fc, b_fc)
    out = jax.block_until_ready(out)
    ref = _reference_forward(x, w_ih, w_hh, b_ih, b_hh, w_fc, b_fc)
    assert out.shape == (batch, output_size), out.shape
    assert jnp.allclose(out, ref, atol=1e-5, rtol=1e-5), \
        float(jnp.max(jnp.abs(out - ref)))

    # --- multi-chunk path (chunk snaps to a divisor of seq, no masking) ------
    seq2 = 20
    x2 = jax.random.normal(ks[7], (batch, seq2, input_size), jnp.float32)
    out2 = rnn_model_forward(x2, w_ih, w_hh, b_ih, b_hh, w_fc, b_fc,
                             time_chunk=8)
    out2 = jax.block_until_ready(out2)
    ref2 = _reference_forward(x2, w_ih, w_hh, b_ih, b_hh, w_fc, b_fc)
    assert jnp.allclose(out2, ref2, atol=1e-5, rtol=1e-5), \
        float(jnp.max(jnp.abs(out2 - ref2)))

    # --- ragged (prime) seq path: exercises the in-kernel tail masking -------
    seq3 = 13
    x3 = jax.random.normal(ks[8], (batch, seq3, input_size), jnp.float32)
    out3 = rnn_model_forward(x3, w_ih, w_hh, b_ih, b_hh, w_fc, b_fc,
                             time_chunk=8)
    out3 = jax.block_until_ready(out3)
    ref3 = _reference_forward(x3, w_ih, w_hh, b_ih, b_hh, w_fc, b_fc)
    assert jnp.allclose(out3, ref3, atol=1e-5, rtol=1e-5), \
        float(jnp.max(jnp.abs(out3 - ref3)))

    # --- bf16-weight MXU path (loose tolerance; h/tanh stay f32) ------------
    out_bf16 = rnn_model_forward(x, w_ih, w_hh, b_ih, b_hh, w_fc, b_fc,
                                 param_dtype=jnp.bfloat16)
    out_bf16 = jax.block_until_ready(out_bf16)
    assert jnp.allclose(out_bf16, ref, atol=1e-1, rtol=1e-1), \
        float(jnp.max(jnp.abs(out_bf16 - ref)))

    # TODO(synk): the module's forward() also does a host-side print of the hidden
    # shape; that debug print has no in-kernel equivalent and is intentionally omitted.
    print("KERNEL_OK")
</pallas_src>

<mosaic_0001>
module attributes {stable_mosaic.version = 11 : i64} {
  func.func @_rnn_fc_kernel(%arg0: i32, %arg1: i32, %arg2: memref<8x8x128xf32, #tpu.memory_space<vmem>>, %arg3: memref<128x128xf32, #tpu.memory_space<vmem>>, %arg4: memref<128x128xf32, #tpu.memory_space<vmem>>, %arg5: memref<1x128xf32, #tpu.memory_space<vmem>>, %arg6: memref<8x128xf32, #tpu.memory_space<vmem>>, %arg7: memref<8x128xf32, #tpu.memory_space<vmem>>) attributes {dimension_semantics = [#tpu.dimension_semantics<parallel>, #tpu.dimension_semantics<arbitrary>], iteration_bounds = array<i64: 1, 1>, scalar_prefetch = 0 : i64, scratch_operands = 1 : i64, tpu.core_type = #tpu.core_type<tc>, window_params = [{transform_indices = @transform_0, window_bounds = array<i64: 8, 8, 128>}, {pipeline_mode = #tpu.pipeline_mode<synchronous>, transform_indices = @transform_1, window_bounds = array<i64: 128, 128>}, {pipeline_mode = #tpu.pipeline_mode<synchronous>, transform_indices = @transform_2, window_bounds = array<i64: 128, 128>}, {pipeline_mode = #tpu.pipeline_mode<synchronous>, transform_indices = @transform_3, window_bounds = array<i64: 1, 128>}, {transform_indices = @transform_4, window_bounds = array<i64: 8, 128>}]} {
    %c0_i32 = arith.constant 0 : i32
    %0 = arith.cmpi eq, %arg1, %c0_i32 : i32
    %1 = arith.extui %0 : i1 to i32
    %c0_i32_0 = arith.constant 0 : i32
    %2 = arith.cmpi ne, %1, %c0_i32_0 : i32
    scf.if %2 {
      %cst_32 = arith.constant 0.000000e+00 : f32
      %57 = vector.broadcast %cst_32 : f32 to vector<8x128xf32>
      %c0_33 = arith.constant 0 : index
      %c0_34 = arith.constant 0 : index
      %58 = vector.load %arg7[%c0_33, %c0_34] : memref<8x128xf32, #tpu.memory_space<vmem>>, vector<8x128xf32>
      tpu.vector_store %arg7[%c0_33, %c0_34], %57 {strides = array<i32>} : memref<8x128xf32, #tpu.memory_space<vmem>>, vector<8x128xf32>,
    } else {
    }
    %c0 = arith.constant 0 : index
    %c0_1 = arith.constant 0 : index
    %3 = vector.load %arg3[%c0, %c0_1] : memref<128x128xf32, #tpu.memory_space<vmem>>, vector<128x128xf32>
    %c0_2 = arith.constant 0 : index
    %c0_3 = arith.constant 0 : index
    %4 = vector.load %arg7[%c0_2, %c0_3] : memref<8x128xf32, #tpu.memory_space<vmem>>, vector<8x128xf32>
    %c0_i32_4 = arith.constant 0 : i32
    %5 = arith.index_cast %c0_i32_4 : i32 to index
    %c0_5 = arith.constant 0 : index
    %c0_6 = arith.constant 0 : index
    %6 = vector.load %arg2[%5, %c0_5, %c0_6] : memref<8x8x128xf32, #tpu.memory_space<vmem>>, vector<1x8x128xf32>
    %7 = vector.shape_cast %6 : vector<1x8x128xf32> to vector<8x128xf32>
    %cst = arith.constant dense<0.000000e+00> : vector<8x128xf32>
    %8 = tpu.matmul %4, %3, %cst {dimension_numbers = #tpu.dot_dimension_numbers<[1], [0], [0], [1], [0, 0, 1, 1], [], []>} : vector<8x128xf32>, vector<128x128xf32>, vector<8x128xf32> -> vector<8x128xf32>
    %9 = arith.addf %7, %8 : vector<8x128xf32>
    %10 = math.tanh %9 : vector<8x128xf32>
    %c1_i32 = arith.constant 1 : i32
    %11 = arith.index_cast %c1_i32 : i32 to index
    %c0_7 = arith.constant 0 : index
    %c0_8 = arith.constant 0 : index
    %12 = vector.load %arg2[%11, %c0_7, %c0_8] : memref<8x8x128xf32, #tpu.memory_space<vmem>>, vector<1x8x128xf32>
    %13 = vector.shape_cast %12 : vector<1x8x128xf32> to vector<8x128xf32>
    %cst_9 = arith.constant dense<0.000000e+00> : vector<8x128xf32>
    %14 = tpu.matmul %10, %3, %cst_9 {dimension_numbers = #tpu.dot_dimension_numbers<[1], [0], [0], [1], [0, 0, 1, 1], [], []>} : vector<8x128xf32>, vector<128x128xf32>, vector<8x128xf32> -> vector<8x128xf32>
    %15 = arith.addf %13, %14 : vector<8x128xf32>
    %16 = math.tanh %15 : vector<8x128xf32>
    %c2_i32 = arith.constant 2 : i32
    %17 = arith.index_cast %c2_i32 : i32 to index
    %c0_10 = arith.constant 0 : index
    %c0_11 = arith.constant 0 : index
    %18 = vector.load %arg2[%17, %c0_10, %c0_11] : memref<8x8x128xf32, #tpu.memory_space<vmem>>, vector<1x8x128xf32>
    %19 = vector.shape_cast %18 : vector<1x8x128xf32> to vector<8x128xf32>
    %cst_12 = arith.constant dense<0.000000e+00> : vector<8x128xf32>
    %20 = tpu.matmul %16, %3, %cst_12 {dimension_numbers = #tpu.dot_dimension_numbers<[1], [0], [0], [1], [0, 0, 1, 1], [], []>} : vector<8x128xf32>, vector<128x128xf32>, vector<8x128xf32> -> vector<8x128xf32>
    %21 = arith.addf %19, %20 : vector<8x128xf32>
    %22 = math.tanh %21 : vector<8x128xf32>
    %c3_i32 = arith.constant 3 : i32
    %23 = arith.index_cast %c3_i32 : i32 to index
    %c0_13 = arith.constant 0 : index
    %c0_14 = arith.constant 0 : index
    %24 = vector.load %arg2[%23, %c0_13, %c0_14] : memref<8x8x128xf32, #tpu.memory_space<vmem>>, vector<1x8x128xf32>
    %25 = vector.shape_cast %24 : vector<1x8x128xf32> to vector<8x128xf32>
    %cst_15 = arith.constant dense<0.000000e+00> : vector<8x128xf32>
    %26 = tpu.matmul %22, %3, %cst_15 {dimension_numbers = #tpu.dot_dimension_numbers<[1], [0], [0], [1], [0, 0, 1, 1], [], []>} : vector<8x128xf32>, vector<128x128xf32>, vector<8x128xf32> -> vector<8x128xf32>
    %27 = arith.addf %25, %26 : vector<8x128xf32>
    %28 = math.tanh %27 : vector<8x128xf32>
    %c4_i32 = arith.constant 4 : i32
    %29 = arith.index_cast %c4_i32 : i32 to index
    %c0_16 = arith.constant 0 : index
    %c0_17 = arith.constant 0 : index
    %30 = vector.load %arg2[%29, %c0_16, %c0_17] : memref<8x8x128xf32, #tpu.memory_space<vmem>>, vector<1x8x128xf32>
    %31 = vector.shape_cast %30 : vector<1x8x128xf32> to vector<8x128xf32>
    %cst_18 = arith.constant dense<0.000000e+00> : vector<8x128xf32>
    %32 = tpu.matmul %28, %3, %cst_18 {dimension_numbers = #tpu.dot_dimension_numbers<[1], [0], [0], [1], [0, 0, 1, 1], [], []>} : vector<8x128xf32>, vector<128x128xf32>, vector<8x128xf32> -> vector<8x128xf32>
    %33 = arith.addf %31, %32 : vector<8x128xf32>
    %34 = math.tanh %33 : vector<8x128xf32>
    %c5_i32 = arith.constant 5 : i32
    %35 = arith.index_cast %c5_i32 : i32 to index
    %c0_19 = arith.constant 0 : index
    %c0_20 = arith.constant 0 : index
    %36 = vector.load %arg2[%35, %c0_19, %c0_20] : memref<8x8x128xf32, #tpu.memory_space<vmem>>, vector<1x8x128xf32>
    %37 = vector.shape_cast %36 : vector<1x8x128xf32> to vector<8x128xf32>
    %cst_21 = arith.constant dense<0.000000e+00> : vector<8x128xf32>
    %38 = tpu.matmul %34, %3, %cst_21 {dimension_numbers = #tpu.dot_dimension_numbers<[1], [0], [0], [1], [0, 0, 1, 1], [], []>} : vector<8x128xf32>, vector<128x128xf32>, vector<8x128xf32> -> vector<8x128xf32>
    %39 = arith.addf %37, %38 : vector<8x128xf32>
    %40 = math.tanh %39 : vector<8x128xf32>
    %c6_i32 = arith.constant 6 : i32
    %41 = arith.index_cast %c6_i32 : i32 to index
    %c0_22 = arith.constant 0 : index
    %c0_23 = arith.constant 0 : index
    %42 = vector.load %arg2[%41, %c0_22, %c0_23] : memref<8x8x128xf32, #tpu.memory_space<vmem>>, vector<1x8x128xf32>
    %43 = vector.shape_cast %42 : vector<1x8x128xf32> to vector<8x128xf32>
    %cst_24 = arith.constant dense<0.000000e+00> : vector<8x128xf32>
    %44 = tpu.matmul %40, %3, %cst_24 {dimension_numbers = #tpu.dot_dimension_numbers<[1], [0], [0], [1], [0, 0, 1, 1], [], []>} : vector<8x128xf32>, vector<128x128xf32>, vector<8x128xf32> -> vector<8x128xf32>
    %45 = arith.addf %43, %44 : vector<8x128xf32>
    %46 = math.tanh %45 : vector<8x128xf32>
    %c7_i32 = arith.constant 7 : i32
    %47 = arith.index_cast %c7_i32 : i32 to index
    %c0_25 = arith.constant 0 : index
    %c0_26 = arith.constant 0 : index
    %48 = vector.load %arg2[%47, %c0_25, %c0_26] : memref<8x8x128xf32, #tpu.memory_space<vmem>>, vector<1x8x128xf32>
    %49 = vector.shape_cast %48 : vector<1x8x128xf32> to vector<8x128xf32>
    %cst_27 = arith.constant dense<0.000000e+00> : vector<8x128xf32>
    %50 = tpu.matmul %46, %3, %cst_27 {dimension_numbers = #tpu.dot_dimension_numbers<[1], [0], [0], [1], [0, 0, 1, 1], [], []>} : vector<8x128xf32>, vector<128x128xf32>, vector<8x128xf32> -> vector<8x128xf32>
    %51 = arith.addf %49, %50 : vector<8x128xf32>
    %52 = math.tanh %51 : vector<8x128xf32>
    %c8_i32 = arith.constant 8 : i32
    %c0_28 = arith.constant 0 : index
    %c0_29 = arith.constant 0 : index
    %53 = vector.load %arg7[%c0_28, %c0_29] : memref<8x128xf32, #tpu.memory_space<vmem>>, vector<8x128xf32>
    tpu.vector_store %arg7[%c0_28, %c0_29], %52 {strides = array<i32>} : memref<8x128xf32, #tpu.memory_space<vmem>>, vector<8x128xf32>,
    %c0_i32_30 = arith.constant 0 : i32
    %54 = arith.cmpi eq, %arg1, %c0_i32_30 : i32
    %55 = arith.extui %54 : i1 to i32
    %c0_i32_31 = arith.constant 0 : i32
    %56 = arith.cmpi ne, %55, %c0_i32_31 : i32
    scf.if %56 {
      %c0_32 = arith.constant 0 : index
      %c0_33 = arith.constant 0 : index
      %57 = vector.load %arg4[%c0_32, %c0_33] : memref<128x128xf32, #tpu.memory_space<vmem>>, vector<128x128xf32>
      %cst_34 = arith.constant dense<0.000000e+00> : vector<8x128xf32>
      %58 = tpu.matmul %52, %57, %cst_34 {dimension_numbers = #tpu.dot_dimension_numbers<[1], [0], [0], [1], [0, 0, 1, 1], [], []>} : vector<8x128xf32>, vector<128x128xf32>, vector<8x128xf32> -> vector<8x128xf32>
      %c0_35 = arith.constant 0 : index
      %c0_36 = arith.constant 0 : index
      %59 = vector.load %arg5[%c0_35, %c0_36] : memref<1x128xf32, #tpu.memory_space<vmem>>, vector<1x128xf32>
      %60 = vector.broadcast %59 : vector<1x128xf32> to vector<8x128xf32>
      %61 = arith.addf %58, %60 : vector<8x128xf32>
      %c0_37 = arith.constant 0 : index
      %c0_38 = arith.constant 0 : index
      %62 = vector.load %arg6[%c0_37, %c0_38] : memref<8x128xf32, #tpu.memory_space<vmem>>, vector<8x128xf32>
      tpu.vector_store %arg6[%c0_37, %c0_38], %61 {strides = array<i32>} : memref<8x128xf32, #tpu.memory_space<vmem>>, vector<8x128xf32>,
    } else {
    }
    return
  }
  func.func @transform_0(%arg0: i32, %arg1: i32) -> (i32, i32, i32) {
    %c0_i32 = arith.constant 0 : i32
    %c0_i32_0 = arith.constant 0 : i32
    return %arg1, %arg0, %c0_i32 : i32, i32, i32
  }
  func.func @transform_1(%arg0: i32, %arg1: i32) -> (i32, i32) {
    %c0_i32 = arith.constant 0 : i32
    %c0_i32_0 = arith.constant 0 : i32
    %c0_i32_1 = arith.constant 0 : i32
    return %c0_i32, %c0_i32_0 : i32, i32
  }
  func.func @transform_2(%arg0: i32, %arg1: i32) -> (i32, i32) {
    %c0_i32 = arith.constant 0 : i32
    %c0_i32_0 = arith.constant 0 : i32
    %c0_i32_1 = arith.constant 0 : i32
    return %c0_i32, %c0_i32_0 : i32, i32
  }
  func.func @transform_3(%arg0: i32, %arg1: i32) -> (i32, i32) {
    %c0_i32 = arith.constant 0 : i32
    %c0_i32_0 = arith.constant 0 : i32
    %c0_i32_1 = arith.constant 0 : i32
    return %c0_i32, %c0_i32_0 : i32, i32
  }
  func.func @transform_4(%arg0: i32, %arg1: i32) -> (i32, i32) {
    %c0_i32 = arith.constant 0 : i32
    %c0_i32_0 = arith.constant 0 : i32
    return %arg0, %c0_i32 : i32, i32
  }
}

</mosaic_0001>

<bundles_post_ra>
// kernel: rnn_model_forward.1
= control target key start
LH: loop header
LB: loop body
LE: loop exit
PB: predicated region body
PF: predicated region fallthrough
CT: control target
= control target key end

     0   :  { %v1443_v0 = vmov 0.0|0.0   ;;  %vm1444_vm0 = vmmov 0   ;;  %v1445_v4 = vmov 0.0   ;;  %s1768_s1 = inlined_call_operand.vmem [shape: f32[128,128], index: 1, kind: input, shape index: {}]   ;;  %s1769_s0 = inlined_call_operand.vmem [shape: f32[8,8,128], index: 0, kind: input, shape index: {}]   ;;  %s1770_s2 = inlined_call_operand.vmem [shape: f32[128,128], index: 2, kind: input, shape index: {}]   ;;  %s1771_s3 = inlined_call_operand.vmem [shape: f32[1,128], index: 3, kind: input, shape index: {}]   ;;  %s1772_s4 = inlined_call_operand.vmem [shape: f32[8,128], index: 4, kind: output, shape index: {}]  }
   0x1   :  { %1208 = vmatprep.subr.bf16.mxu0 %v1443_v0  ;;  %v22_v1 = vld [vmem:[%s1768_s1] sm:$0xff]  ;;  %v23_v2 = vld [vmem:[%s1768_s1 + $0x8] sm:$0xff]  ;;  %v24_v3 = vld [vmem:[%s1768_s1 + $0x10] sm:$0xff]  ;;  %925 = vmatprep.mubr.msk.f32.mxu0 %vm1444_vm0, %v1445_v4 }
   0x2   :  { %v1483_v5 = vpack.c.bf16 %v23_v2, %v22_v1  ;;  %v25_v6 = vld [vmem:[%s1768_s1 + $0x18] sm:$0xff]  ;;  %1232 = vmatprep.subr.bf16.mxu1 %v1443_v0  ;;  %960 = vmatprep.mubr.msk.f32.mxu1 %vm1444_vm0, %v1445_v4  ;;  %v26_v8 = vld [vmem:[%s1768_s1 + $0x20] sm:$0xff]  ;;  %v27_v9 = vld [vmem:[%s1768_s1 + $0x28] sm:$0xff] }
   0x3   :  { %v1492_v7 = vpack.c.bf16 %v25_v6, %v24_v3  ;;  %v1504_v10 = vpack.c.bf16 %v27_v9, %v26_v8  ;;  %v28_v11 = vld [vmem:[%s1768_s1 + $0x30] sm:$0xff]  ;;  %v29_v12 = vld [vmem:[%s1768_s1 + $0x38] sm:$0xff]  ;;  %v30_v14 = vld [vmem:[%s1768_s1 + $0x40] sm:$0xff] }
   0x4   :  { %1210 = vmatpush3.bf16.msra.mxu0 %v1483_v5  ;;  %1234 = vmatpush3.bf16.msra.mxu1 %v1483_v5  ;;  %v1516_v13 = vpack.c.bf16 %v29_v12, %v28_v11  ;;  %v31_v15 = vld [vmem:[%s1768_s1 + $0x48] sm:$0xff]  ;;  %v32_v17 = vld [vmem:[%s1768_s1 + $0x50] sm:$0xff]  ;;  %v33_v18 = vld [vmem:[%s1768_s1 + $0x58] sm:$0xff] }
   0x5   :  { %1211 = vmatprep.subr.bf16.mxu0 %v1443_v0  ;;  %1235 = vmatprep.subr.bf16.mxu1 %v1443_v0  ;;  %v1528_v16 = vpack.c.bf16 %v31_v15, %v30_v14  ;;  %v1540_v19 = vpack.c.bf16 %v33_v18, %v32_v17  ;;  %v34_v20 = vld [vmem:[%s1768_s1 + $0x60] sm:$0xff]  ;;  %v35_v21 = vld [vmem:[%s1768_s1 + $0x68] sm:$0xff]  ;;  %v36_v23 = vld [vmem:[%s1768_s1 + $0x70] sm:$0xff] }
   0x6   :  { %v1552_v22 = vpack.c.bf16 %v35_v21, %v34_v20  ;;  %v37_v24 = vld [vmem:[%s1768_s1 + $0x78] sm:$0xff]  ;;  %v39_v26 = vld [vmem:[%s1769_s0] sm:$0xff]  ;;  %v732_v31 = vld [vmem:[%s1769_s0 + $0x8] sm:$0xff] }
   0x7   :  { %v1564_v25 = vpack.c.bf16 %v37_v24, %v36_v23  ;;  %v733_v36 = vld [vmem:[%s1769_s0 + $0x10] sm:$0xff]  ;;  %v734_v41 = vld [vmem:[%s1769_s0 + $0x18] sm:$0xff]  ;;  %v735_v46 = vld [vmem:[%s1769_s0 + $0x20] sm:$0xff] }
   0x8   :  { %1213 = vmatpush3.bf16.msra.mxu0 %v1492_v7  ;;  %1237 = vmatpush3.bf16.msra.mxu1 %v1492_v7  ;;  %v736_v51 = vld [vmem:[%s1769_s0 + $0x28] sm:$0xff]  ;;  %v634_v56 = vld [vmem:[%s1770_s2] sm:$0xff]  ;;  %v636_v58 = vld [vmem:[%s1770_s2 + $0x10] sm:$0xff] }
   0x9   :  { %1214 = vmatprep.subr.bf16.mxu0 %v1443_v0  ;;  %1238 = vmatprep.subr.bf16.mxu1 %v1443_v0  ;;  %v635_v57 = vld [vmem:[%s1770_s2 + $0x8] sm:$0xff]  ;;  %v637_v60 = vld [vmem:[%s1770_s2 + $0x18] sm:$0xff]  ;;  %v638_v62 = vld [vmem:[%s1770_s2 + $0x20] sm:$0xff] }
   0xa   :  { %v1401_v59 = vpack.c.bf16 %v635_v57, %v634_v56  ;;  %v1404_v61 = vpack.c.bf16 %v637_v60, %v636_v58  ;;  %v639_v63 = vld [vmem:[%s1770_s2 + $0x28] sm:$0xff]  ;;  %v640_v2 = vld [vmem:[%s1770_s2 + $0x30] sm:$0xff]  ;;  %v641_v3 = vld [vmem:[%s1770_s2 + $0x38] sm:$0xff] }
   0xb   :  { %v1407_v1 = vpack.c.bf16 %v639_v63, %v638_v62  ;;  %v643_v6 = vld [vmem:[%s1770_s2 + $0x48] sm:$0xff]  ;;  %v737_v8 = vld [vmem:[%s1769_s0 + $0x30] sm:$0xff]  ;;  %v645_v14 = vld [vmem:[%s1770_s2 + $0x58] sm:$0xff] }
   0xc   :  { %1216 = vmatpush3.bf16.msra.mxu0 %v1504_v10  ;;  %1240 = vmatpush3.bf16.msra.mxu1 %v1504_v10  ;;  %v647_v17 = vld [vmem:[%s1770_s2 + $0x68] sm:$0xff]  ;;  %v649_v20 = vld [vmem:[%s1770_s2 + $0x78] sm:$0xff] }
   0xd   :  { %1217 = vmatprep.subr.bf16.mxu0 %v1443_v0  ;;  %1241 = vmatprep.subr.bf16.mxu1 %v1443_v0 }
  0x10   :  { %1219 = vmatpush3.bf16.msra.mxu0 %v1516_v13  ;;  %1243 = vmatpush3.bf16.msra.mxu1 %v1516_v13 }
  0x11   :  { %1220 = vmatprep.subr.bf16.mxu0 %v1443_v0  ;;  %1244 = vmatprep.subr.bf16.mxu1 %v1443_v0 }
  0x14   :  { %1222 = vmatpush3.bf16.msra.mxu0 %v1528_v16  ;;  %1246 = vmatpush3.bf16.msra.mxu1 %v1528_v16 }
  0x15   :  { %1223 = vmatprep.subr.bf16.mxu0 %v1443_v0  ;;  %1247 = vmatprep.subr.bf16.mxu1 %v1443_v0 }
  0x18   :  { %1225 = vmatpush3.bf16.msra.mxu0 %v1540_v19  ;;  %1249 = vmatpush3.bf16.msra.mxu1 %v1540_v19 }
  0x19   :  { %1226 = vmatprep.subr.bf16.mxu0 %v1443_v0  ;;  %1250 = vmatprep.subr.bf16.mxu1 %v1443_v0 }
  0x1c   :  { %1228 = vmatpush3.bf16.msra.mxu0 %v1552_v22  ;;  %1252 = vmatpush3.bf16.msra.mxu1 %v1552_v22 }
  0x1d   :  { %1229 = vmatprep.subr.bf16.mxu0 %v1443_v0  ;;  %1253 = vmatprep.subr.bf16.mxu1 %v1443_v0 }
  0x20   :  { %1231 = vmatpush3.bf16.msra.mxu0 %v1564_v25  ;;  %1255 = vmatpush3.bf16.msra.mxu1 %v1564_v25 }
  0x21   :  { %1256 = vmatprep.subr.bf16.mxu0 %v1443_v0  ;;  %1280 = vmatprep.subr.bf16.mxu1 %v1443_v0 }
  0x23   :  { %926 = vmatmul.mubr.f32.vlgmr.msra.gmra.mrb[0].mxu0 %v1445_v4 }
  0x24   :  { %1258 = vmatpush3.bf16.msra.mxu0 %v1483_v5  ;;  %995 = vmatprep.mubr.msk.f32.mxu0 %vm1444_vm0, %v1445_v4 }
  0x25   :  { %1259 = vmatprep.subr.bf16.mxu0 %v1443_v0 }
  0x28   :  { %1261 = vmatpush3.bf16.msra.mxu0 %v1492_v7 }
  0x29   :  { %1262 = vmatprep.subr.bf16.mxu0 %v1443_v0 }
  0x2c   :  { %1264 = vmatpush3.bf16.msra.mxu0 %v1504_v10 }
  0x2d   :  { %1265 = vmatprep.subr.bf16.mxu0 %v1443_v0 }
  0x30   :  { %1267 = vmatpush3.bf16.msra.mxu0 %v1516_v13 }
  0x31   :  { %1268 = vmatprep.subr.bf16.mxu0 %v1443_v0 }
  0x34   :  { %1270 = vmatpush3.bf16.msra.mxu0 %v1528_v16 }
  0x35   :  { %1271 = vmatprep.subr.bf16.mxu0 %v1443_v0 }
  0x38   :  { %1273 = vmatpush3.bf16.msra.mxu0 %v1540_v19 }
  0x39   :  { %1274 = vmatprep.subr.bf16.mxu0 %v1443_v0 }
  0x3c   :  { %1276 = vmatpush3.bf16.msra.mxu0 %v1552_v22 }
  0x3d   :  { %1277 = vmatprep.subr.bf16.mxu0 %v1443_v0 }
  0x40   :  { %1279 = vmatpush3.bf16.msra.mxu0 %v1564_v25 }
  0x41   :  { %1304 = vmatprep.subr.bf16.mxu0 %v1443_v0 }
  0xf6   :  { %v106_v27 = vpop.f32.mrb[0].mxu0 }
  0xf7   :  { %v110_v28 = vadd.f32 %v106_v27, %v39_v26  ;;  %v927_v29 = vpop.f32.mrb[1].mxu0  ;;  %v739_v27 = vld [vmem:[%s1771_s3] ss:$0 sm:$0xff] }
  0xf9   :  { %1427 = vtanh.f32 %v110_v28 }
 0x103   :  { %v1428_v30 = vpop.eup %1427 }
 0x104   :  { %961 = vmatmul.mubr.f32.vlgmr.msra.gmra.mrb[0].mxu1 %v1428_v30 }
 0x105   :  { %1282 = vmatpush3.bf16.msra.mxu1 %v1483_v5  ;;  %1030 = vmatprep.mubr.msk.f32.mxu1 %vm1444_vm0, %v1445_v4 }
 0x106   :  { %1283 = vmatprep.subr.bf16.mxu1 %v1443_v0 }
 0x109   :  { %1285 = vmatpush3.bf16.msra.mxu1 %v1492_v7 }
 0x10a   :  { %1286 = vmatprep.subr.bf16.mxu1 %v1443_v0 }
 0x10d   :  { %1288 = vmatpush3.bf16.msra.mxu1 %v1504_v10 }
 0x10e   :  { %1289 = vmatprep.subr.bf16.mxu1 %v1443_v0 }
 0x111   :  { %1291 = vmatpush3.bf16.msra.mxu1 %v1516_v13 }
 0x112   :  { %1292 = vmatprep.subr.bf16.mxu1 %v1443_v0 }
 0x115   :  { %1294 = vmatpush3.bf16.msra.mxu1 %v1528_v16 }
 0x116   :  { %1295 = vmatprep.subr.bf16.mxu1 %v1443_v0 }
 0x119   :  { %1297 = vmatpush3.bf16.msra.mxu1 %v1540_v19 }
 0x11a   :  { %1298 = vmatprep.subr.bf16.mxu1 %v1443_v0 }
 0x11d   :  { %1300 = vmatpush3.bf16.msra.mxu1 %v1552_v22 }
 0x11e   :  { %1301 = vmatprep.subr.bf16.mxu1 %v1443_v0 }
 0x121   :  { %1303 = vmatpush3.bf16.msra.mxu1 %v1564_v25 }
 0x122   :  { %1328 = vmatprep.subr.bf16.mxu1 %v1443_v0 }
 0x1d7   :  { %v180_v32 = vpop.f32.mrb[0].mxu1 }
 0x1d8   :  { %v184_v33 = vadd.f32 %v732_v31, %v180_v32  ;;  %v962_v34 = vpop.f32.mrb[1].mxu1 }
 0x1da   :  { %1429 = vtanh.f32 %v184_v33 }
 0x1e4   :  { %v1430_v35 = vpop.eup %1429 }
 0x1e5   :  { %996 = vmatmul.mubr.f32.vlgmr.msra.gmra.mrb[2].mxu0 %v1430_v35 }
 0x1e6   :  { %1306 = vmatpush3.bf16.msra.mxu0 %v1483_v5  ;;  %1065 = vmatprep.mubr.msk.f32.mxu0 %vm1444_vm0, %v1445_v4 }
 0x1e7   :  { %1307 = vmatprep.subr.bf16.mxu0 %v1443_v0 }
 0x1ea   :  { %1309 = vmatpush3.bf16.msra.mxu0 %v1492_v7 }
 0x1eb   :  { %1310 = vmatprep.subr.bf16.mxu0 %v1443_v0 }
 0x1ee   :  { %1312 = vmatpush3.bf16.msra.mxu0 %v1504_v10 }
 0x1ef   :  { %1313 = vmatprep.subr.bf16.mxu0 %v1443_v0 }
 0x1f2   :  { %1315 = vmatpush3.bf16.msra.mxu0 %v1516_v13 }
 0x1f3   :  { %1316 = vmatprep.subr.bf16.mxu0 %v1443_v0 }
 0x1f6   :  { %1318 = vmatpush3.bf16.msra.mxu0 %v1528_v16 }
 0x1f7   :  { %1319 = vmatprep.subr.bf16.mxu0 %v1443_v0 }
 0x1fa   :  { %1321 = vmatpush3.bf16.msra.mxu0 %v1540_v19 }
 0x1fb   :  { %1322 = vmatprep.subr.bf16.mxu0 %v1443_v0 }
 0x1fe   :  { %1324 = vmatpush3.bf16.msra.mxu0 %v1552_v22 }
 0x1ff   :  { %1325 = vmatprep.subr.bf16.mxu0 %v1443_v0 }
 0x202   :  { %1327 = vmatpush3.bf16.msra.mxu0 %v1564_v25 }
 0x203   :  { %1352 = vmatprep.subr.bf16.mxu0 %v1443_v0 }
 0x2b8   :  { %v254_v37 = vpop.f32.mrb[2].mxu0 }
 0x2b9   :  { %v258_v38 = vadd.f32 %v733_v36, %v254_v37  ;;  %v997_v39 = vpop.f32.mrb[3].mxu0 }
 0x2bb   :  { %1431 = vtanh.f32 %v258_v38 }
 0x2c5   :  { %v1432_v40 = vpop.eup %1431 }
 0x2c6   :  { %1031 = vmatmul.mubr.f32.vlgmr.msra.gmra.mrb[2].mxu1 %v1432_v40 }
 0x2c7   :  { %1330 = vmatpush3.bf16.msra.mxu1 %v1483_v5  ;;  %1100 = vmatprep.mubr.msk.f32.mxu1 %vm1444_vm0, %v1445_v4 }
 0x2c8   :  { %1331 = vmatprep.subr.bf16.mxu1 %v1443_v0 }
 0x2cb   :  { %1333 = vmatpush3.bf16.msra.mxu1 %v1492_v7 }
 0x2cc   :  { %1334 = vmatprep.subr.bf16.mxu1 %v1443_v0 }
 0x2cf   :  { %1336 = vmatpush3.bf16.msra.mxu1 %v1504_v10 }
 0x2d0   :  { %1337 = vmatprep.subr.bf16.mxu1 %v1443_v0 }
 0x2d3   :  { %1339 = vmatpush3.bf16.msra.mxu1 %v1516_v13 }
 0x2d4   :  { %1340 = vmatprep.subr.bf16.mxu1 %v1443_v0 }
 0x2d7   :  { %1342 = vmatpush3.bf16.msra.mxu1 %v1528_v16 }
 0x2d8   :  { %1343 = vmatprep.subr.bf16.mxu1 %v1443_v0 }
 0x2db   :  { %1345 = vmatpush3.bf16.msra.mxu1 %v1540_v19 }
 0x2dc   :  { %1346 = vmatprep.subr.bf16.mxu1 %v1443_v0 }
 0x2df   :  { %1348 = vmatpush3.bf16.msra.mxu1 %v1552_v22 }
 0x2e0   :  { %1349 = vmatprep.subr.bf16.mxu1 %v1443_v0 }
 0x2e3   :  { %1351 = vmatpush3.bf16.msra.mxu1 %v1564_v25 }
 0x2e4   :  { %1376 = vmatprep.subr.bf16.mxu1 %v1443_v0 }
 0x399   :  { %v328_v42 = vpop.f32.mrb[2].mxu1 }
 0x39a   :  { %v332_v43 = vadd.f32 %v734_v41, %v328_v42  ;;  %v1032_v44 = vpop.f32.mrb[3].mxu1 }
 0x39c   :  { %1433 = vtanh.f32 %v332_v43 }
 0x3a6   :  { %v1434_v45 = vpop.eup %1433 }
 0x3a7   :  { %1066 = vmatmul.mubr.f32.vlgmr.msra.gmra.mrb[4].mxu0 %v1434_v45 }
 0x3a8   :  { %1354 = vmatpush3.bf16.msra.mxu0 %v1483_v5  ;;  %1135 = vmatprep.mubr.msk.f32.mxu0 %vm1444_vm0, %v1445_v4 }
 0x3a9   :  { %1355 = vmatprep.subr.bf16.mxu0 %v1443_v0 }
 0x3ac   :  { %1357 = vmatpush3.bf16.msra.mxu0 %v1492_v7 }
 0x3ad   :  { %1358 = vmatprep.subr.bf16.mxu0 %v1443_v0 }
 0x3b0   :  { %1360 = vmatpush3.bf16.msra.mxu0 %v1504_v10 }
 0x3b1   :  { %1361 = vmatprep.subr.bf16.mxu0 %v1443_v0 }
 0x3b4   :  { %1363 = vmatpush3.bf16.msra.mxu0 %v1516_v13 }
 0x3b5   :  { %1364 = vmatprep.subr.bf16.mxu0 %v1443_v0 }
 0x3b8   :  { %1366 = vmatpush3.bf16.msra.mxu0 %v1528_v16 }
 0x3b9   :  { %1367 = vmatprep.subr.bf16.mxu0 %v1443_v0 }
 0x3bc   :  { %1369 = vmatpush3.bf16.msra.mxu0 %v1540_v19 }
 0x3bd   :  { %1370 = vmatprep.subr.bf16.mxu0 %v1443_v0 }
 0x3c0   :  { %1372 = vmatpush3.bf16.msra.mxu0 %v1552_v22 }
 0x3c1   :  { %1373 = vmatprep.subr.bf16.mxu0 %v1443_v0 }
 0x3c4   :  { %1375 = vmatpush3.bf16.msra.mxu0 %v1564_v25 }
 0x3c5   :  { %1400 = vmatprep.subr.bf16.mxu0 %v1443_v0 }
 0x47a   :  { %v402_v47 = vpop.f32.mrb[4].mxu0 }
 0x47b   :  { %v406_v48 = vadd.f32 %v735_v46, %v402_v47  ;;  %v1067_v49 = vpop.f32.mrb[5].mxu0 }
 0x47d   :  { %1435 = vtanh.f32 %v406_v48 }
 0x487   :  { %v1436_v50 = vpop.eup %1435 }
 0x488   :  { %1101 = vmatmul.mubr.f32.vlgmr.msra.gmra.mrb[4].mxu1 %v1436_v50 }
 0x489   :  { %1378 = vmatpush3.bf16.msra.mxu1 %v1483_v5  ;;  %1170 = vmatprep.mubr.msk.f32.mxu1 %vm1444_vm0, %v1445_v4  ;;  %v642_v5 = vld [vmem:[%s1770_s2 + $0x40] sm:$0xff] }
 0x48a   :  { %1379 = vmatprep.subr.bf16.mxu1 %v1443_v0 }
 0x48d   :  { %1381 = vmatpush3.bf16.msra.mxu1 %v1492_v7  ;;  %v1413_v7 = vpack.c.bf16 %v643_v6, %v642_v5 }
 0x48e   :  { %1382 = vmatprep.subr.bf16.mxu1 %v1443_v0 }
 0x491   :  { %1384 = vmatpush3.bf16.msra.mxu1 %v1504_v10 }
 0x492   :  { %1385 = vmatprep.subr.bf16.mxu1 %v1443_v0 }
 0x495   :  { %1387 = vmatpush3.bf16.msra.mxu1 %v1516_v13  ;;  %v644_v13 = vld [vmem:[%s1770_s2 + $0x50] sm:$0xff] }
 0x496   :  { %1388 = vmatprep.subr.bf16.mxu1 %v1443_v0  ;;  %v1416_v15 = vpack.c.bf16 %v645_v14, %v644_v13 }
 0x499   :  { %1390 = vmatpush3.bf16.msra.mxu1 %v1528_v16  ;;  %v646_v16 = vld [vmem:[%s1770_s2 + $0x60] sm:$0xff] }
 0x49a   :  { %1391 = vmatprep.subr.bf16.mxu1 %v1443_v0  ;;  %v1419_v18 = vpack.c.bf16 %v647_v17, %v646_v16 }
 0x49d   :  { %1393 = vmatpush3.bf16.msra.mxu1 %v1540_v19  ;;  %v648_v19 = vld [vmem:[%s1770_s2 + $0x70] sm:$0xff] }
 0x49e   :  { %1394 = vmatprep.subr.bf16.mxu1 %v1443_v0  ;;  %v1422_v21 = vpack.c.bf16 %v649_v20, %v648_v19 }
 0x4a1   :  { %1396 = vmatpush3.bf16.msra.mxu1 %v1552_v22  ;;  %v738_v22 = vld [vmem:[%s1769_s0 + $0x38] sm:$0xff] }
 0x4a2   :  { %1397 = vmatprep.subr.bf16.mxu1 %v1443_v0 }
 0x4a5   :  { %1399 = vmatpush3.bf16.msra.mxu1 %v1564_v25 }
 0x55b   :  { %v476_v52 = vpop.f32.mrb[4].mxu1 }
 0x55c   :  { %v480_v53 = vadd.f32 %v736_v51, %v476_v52  ;;  %v1102_v54 = vpop.f32.mrb[5].mxu1 }
 0x55e   :  { %1437 = vtanh.f32 %v480_v53 }
 0x568   :  { %v1438_v55 = vpop.eup %1437 }
 0x569   :  { %1136 = vmatmul.mubr.f32.vlgmr.msra.gmra.mrb[6].mxu0 %v1438_v55 }
 0x56a   :  { %1205 = vmatprep.mubr.msk.f32.mxu0 %vm1444_vm0, %v1445_v4  ;;  %1402 = vmatpush3.bf16.msra.mxu0 %v1401_v59  ;;  %v1410_v4 = vpack.c.bf16 %v641_v3, %v640_v2 }
 0x56b   :  { %1403 = vmatprep.subr.bf16.mxu0 %v1443_v0 }
 0x56e   :  { %1405 = vmatpush3.bf16.msra.mxu0 %v1404_v61 }
 0x56f   :  { %1406 = vmatprep.subr.bf16.mxu0 %v1443_v0 }
 0x572   :  { %1408 = vmatpush3.bf16.msra.mxu0 %v1407_v1 }
 0x573   :  { %1409 = vmatprep.subr.bf16.mxu0 %v1443_v0 }
 0x576   :  { %1411 = vmatpush3.bf16.msra.mxu0 %v1410_v4 }
 0x577   :  { %1412 = vmatprep.subr.bf16.mxu0 %v1443_v0 }
 0x57a   :  { %1414 = vmatpush3.bf16.msra.mxu0 %v1413_v7 }
 0x57b   :  { %1415 = vmatprep.subr.bf16.mxu0 %v1443_v0 }
 0x57e   :  { %1417 = vmatpush3.bf16.msra.mxu0 %v1416_v15 }
 0x57f   :  { %1418 = vmatprep.subr.bf16.mxu0 %v1443_v0 }
 0x582   :  { %1420 = vmatpush3.bf16.msra.mxu0 %v1419_v18 }
 0x583   :  { %1421 = vmatprep.subr.bf16.mxu0 %v1443_v0 }
 0x586   :  { %1423 = vmatpush3.bf16.msra.mxu0 %v1422_v21 }
 0x63c   :  { %v550_v9 = vpop.f32.mrb[6].mxu0 }
 0x63d   :  { %v554_v10 = vadd.f32 %v737_v8, %v550_v9  ;;  %v1137_v11 = vpop.f32.mrb[7].mxu0 }
 0x63f   :  { %1439 = vtanh.f32 %v554_v10 }
 0x649   :  { %v1440_v12 = vpop.eup %1439 }
 0x64a   :  { %1171 = vmatmul.mubr.f32.vlgmr.msra.gmra.mrb[6].mxu1 %v1440_v12 }
 0x71d   :  { %v624_v23 = vpop.f32.mrb[6].mxu1 }
 0x71e   :  { %v628_v24 = vadd.f32 %v738_v22, %v624_v23  ;;  %v1172_v25 = vpop.f32.mrb[7].mxu1 }
 0x720   :  { %1441 = vtanh.f32 %v628_v24 }
 0x72a   :  { %v1442_v26 = vpop.eup %1441 }
 0x72b   :  { %1206 = vmatmul.mubr.f32.vlgmr.msra.gmra.mrb[8].mxu0 %v1442_v26 }
 0x7fe   :  { %v723_v28 = vpop.f32.mrb[8].mxu0 }
 0x7ff   :  { %v724_v29 = vadd.f32 %v739_v27, %v723_v28  ;;  %v1207_v30 = vpop.f32.mrb[9].mxu0 }
 0x801   :  { %727 = vst [vmem:[%s1772_s4] sm:$0xff] %v724_v29 }

</bundles_post_ra>
